<compile_context>
chip_gen: v7x
topology: tpu7x:2x2x1
jax: 0.10.0
libtpu: 0.0.40
codegen_flags: <defaults>
</compile_context>

<pallas_src>
import jax
import jax.numpy as jnp
from jax.experimental import pallas as pl
from jax.experimental.pallas import tpu as pltpu


def linreg_kernel(batch_ref, embed_ref, w1_ref, b1_ref, w2_ref, b2_ref,
                  out_ref, sum_ref, cnt_ref):
    g = pl.program_id(0)                      # graph-tile index (parallel)
    k = pl.program_id(1)                      # node-tile index (reduction)
    nk = pl.num_programs(1)
    TG = out_ref.shape[0]
    TN = embed_ref.shape[0]

    # ---- init accumulators on the first node tile ----
    @pl.when(k == 0)
    def _():
        sum_ref[...] = jnp.zeros_like(sum_ref)
        cnt_ref[...] = jnp.zeros_like(cnt_ref)

    # ---- per-tile one-hot segment sum (never materializes the full (G, N) one-hot) ----
    batch = batch_ref[...]                                            # (1, TN) int32
    graph_ids = jax.lax.broadcasted_iota(jnp.int32, (TG, TN), 0) + g * TG
    onehot = (graph_ids == batch).astype(jnp.float32)                 # (TG, TN)
    sum_ref[...] += jnp.dot(onehot, embed_ref[...],
                            preferred_element_type=jnp.float32)       # (TG, D)
    cnt_ref[...] += jnp.sum(onehot, axis=1, keepdims=True)            # (TG, 1)

    # ---- finalize on the last node tile: mean pool -> MLP -> clamp ----
    @pl.when(k == nk - 1)
    def _():
        counts = jnp.maximum(cnt_ref[...], 1.0)                       # empty-graph guard
        h_graph = sum_ref[...] * pl.reciprocal(counts, approx=False)  # mean pool
        h = jnp.dot(h_graph, w1_ref[...],
                    preferred_element_type=jnp.float32) + b1_ref[...]
        h = jnp.maximum(h, 0.0)
        out = jnp.dot(h, w2_ref[...],
                      preferred_element_type=jnp.float32) + b2_ref[...]
        out_ref[...] = jnp.clip(out, 0.0, 20.0)                       # eval-mode clamp


def _round_up(x, m):
    return (x + m - 1) // m * m


def linreg_forward(embed, batch, num_graphs, w1, b1, w2, b2, *,
                   tile_n=4096, max_tile_g=128,
                   vmem_limit_bytes=32 * 1024 * 1024):
    """embed: (N, D) f32; batch: (N,) int32 graph id per node; returns (num_graphs, T)."""
    N, D = embed.shape
    T = w2.shape[1]
    G = int(num_graphs)

    # --- node tiling: TILE_N multiple of 128 (lane-aligned batch-id blocks, sublane-aligned embed) ---
    TILE_N = min(int(tile_n), _round_up(N, 128))
    TILE_N = _round_up(TILE_N, 128)
    N_pad = _round_up(N, TILE_N)

    # --- graph tiling: TILE_G multiple of 8 (sublane-aligned scratch/output rows) ---
    TILE_G = max_tile_g if G >= max_tile_g else _round_up(G, 8)
    G_pad = _round_up(G, TILE_G)

    # --- pad inputs; padded nodes get batch id -1 so they match no graph row ---
    embed = embed.astype(jnp.float32)
    batch = batch.astype(jnp.int32)
    if N_pad != N:
        embed = jnp.pad(embed, ((0, N_pad - N), (0, 0)))
        batch = jnp.pad(batch, (0, N_pad - N), constant_values=-1)
    batch2d = batch.reshape(1, N_pad)
    b1_2d = b1.reshape(1, D).astype(jnp.float32)
    b2_2d = b2.reshape(1, T).astype(jnp.float32)

    grid = (G_pad // TILE_G, N_pad // TILE_N)

    out_padded = pl.pallas_call(
        linreg_kernel,
        out_shape=jax.ShapeDtypeStruct((G_pad, T), jnp.float32),
        grid_spec=pltpu.PrefetchScalarGridSpec(
            num_scalar_prefetch=0,
            grid=grid,
            in_specs=[
                pl.BlockSpec((1, TILE_N), lambda g, k: (0, k)),   # batch ids (per N-tile)
                pl.BlockSpec((TILE_N, D), lambda g, k: (k, 0)),   # embed    (per N-tile, streamed)
                pl.BlockSpec((D, D),      lambda g, k: (0, 0)),   # W1 (VMEM-resident, loaded once)
                pl.BlockSpec((1, D),      lambda g, k: (0, 0)),   # b1
                pl.BlockSpec((D, T),      lambda g, k: (0, 0)),   # W2
                pl.BlockSpec((1, T),      lambda g, k: (0, 0)),   # b2
            ],
            out_specs=pl.BlockSpec((TILE_G, T), lambda g, k: (g, 0)),
            scratch_shapes=[
                pltpu.VMEM((TILE_G, D), jnp.float32),             # pooled sum accumulator
                pltpu.VMEM((TILE_G, 1), jnp.float32),             # node count accumulator
            ],
        ),
        compiler_params=pltpu.CompilerParams(
            dimension_semantics=("parallel", "arbitrary"),
            vmem_limit_bytes=vmem_limit_bytes,
        ),
    )(batch2d, embed, w1.astype(jnp.float32), b1_2d, w2.astype(jnp.float32), b2_2d)

    return out_padded[:G]


if __name__ == "__main__":
    # small, forward-consistent shapes
    embed_dim = 32      # embed_dim of LinReg / MLP hidden
    num_tasks = 1
    num_nodes = 8       # total nodes across the batch of graphs
    num_graphs = 2

    key = jax.random.PRNGKey(0)
    k_embed, k_w1, k_b1, k_w2, k_b2 = jax.random.split(key, 5)

    embed = jax.random.normal(k_embed, (num_nodes, embed_dim), dtype=jnp.float32)
    # nodes 0..3 -> graph 0, nodes 4..7 -> graph 1
    batch = jnp.array([0, 0, 0, 0, 1, 1, 1, 1], dtype=jnp.int32)

    # deterministic parameter init (Linear weights stored as [in, out])
    w1 = 0.1 * jax.random.normal(k_w1, (embed_dim, embed_dim), dtype=jnp.float32)
    b1 = 0.1 * jax.random.normal(k_b1, (embed_dim,), dtype=jnp.float32)
    w2 = 0.1 * jax.random.normal(k_w2, (embed_dim, num_tasks), dtype=jnp.float32)
    b2 = 0.1 * jax.random.normal(k_b2, (num_tasks,), dtype=jnp.float32)

    out = linreg_forward(embed, batch, num_graphs, w1, b1, w2, b2)
    jax.block_until_ready(out)

    # reference check in plain JAX
    onehot = (jnp.arange(num_graphs)[:, None] == batch[None, :]).astype(jnp.float32)
    pooled = (onehot @ embed) / jnp.maximum(onehot.sum(1, keepdims=True), 1.0)
    ref = jnp.clip(jnp.maximum(pooled @ w1 + b1, 0.0) @ w2 + b2, 0.0, 20.0)
    assert out.shape == (num_graphs, num_tasks)
    assert jnp.allclose(out, ref, atol=1e-5), (out, ref)

    print("KERNEL_OK")
</pallas_src>

<mosaic_0001>
module attributes {stable_mosaic.version = 11 : i64} {
  func.func @linreg_kernel(%arg0: i32, %arg1: i32, %arg2: memref<1x128xi32, #tpu.memory_space<vmem>>, %arg3: memref<128x32xf32, #tpu.memory_space<vmem>>, %arg4: memref<32x32xf32, #tpu.memory_space<vmem>>, %arg5: memref<1x32xf32, #tpu.memory_space<vmem>>, %arg6: memref<32x1xf32, #tpu.memory_space<vmem>>, %arg7: memref<1x1xf32, #tpu.memory_space<vmem>>, %arg8: memref<8x1xf32, #tpu.memory_space<vmem>>, %arg9: memref<8x32xf32, #tpu.memory_space<vmem>>, %arg10: memref<8x1xf32, #tpu.memory_space<vmem>>) attributes {dimension_semantics = [#tpu.dimension_semantics<parallel>, #tpu.dimension_semantics<arbitrary>], iteration_bounds = array<i64: 1, 1>, scalar_prefetch = 0 : i64, scratch_operands = 2 : i64, tpu.core_type = #tpu.core_type<tc>, window_params = [{transform_indices = @transform_0, window_bounds = array<i64: 1, 128>}, {transform_indices = @transform_1, window_bounds = array<i64: 128, 32>}, {pipeline_mode = #tpu.pipeline_mode<synchronous>, transform_indices = @transform_2, window_bounds = array<i64: 32, 32>}, {pipeline_mode = #tpu.pipeline_mode<synchronous>, transform_indices = @transform_3, window_bounds = array<i64: 1, 32>}, {pipeline_mode = #tpu.pipeline_mode<synchronous>, transform_indices = @transform_4, window_bounds = array<i64: 32, 1>}, {pipeline_mode = #tpu.pipeline_mode<synchronous>, transform_indices = @transform_5, window_bounds = array<i64: 1, 1>}, {transform_indices = @transform_6, window_bounds = array<i64: 8, 1>}]} {
    %c0_i32 = arith.constant 0 : i32
    %0 = arith.cmpi eq, %arg1, %c0_i32 : i32
    %1 = arith.extui %0 : i1 to i32
    %c0_i32_0 = arith.constant 0 : i32
    %2 = arith.cmpi ne, %1, %c0_i32_0 : i32
    scf.if %2 {
      %cst_15 = arith.constant 0.000000e+00 : f32
      %25 = vector.broadcast %cst_15 : f32 to vector<8x32xf32>
      %c0_16 = arith.constant 0 : index
      %c0_17 = arith.constant 0 : index
      %26 = vector.load %arg9[%c0_16, %c0_17] : memref<8x32xf32, #tpu.memory_space<vmem>>, vector<8x32xf32>
      tpu.vector_store %arg9[%c0_16, %c0_17], %25 {strides = array<i32>} : memref<8x32xf32, #tpu.memory_space<vmem>>, vector<8x32xf32>,
      %cst_18 = arith.constant 0.000000e+00 : f32
      %27 = vector.broadcast %cst_18 : f32 to vector<8x1xf32>
      %c0_19 = arith.constant 0 : index
      %c0_20 = arith.constant 0 : index
      %28 = vector.load %arg10[%c0_19, %c0_20] : memref<8x1xf32, #tpu.memory_space<vmem>>, vector<8x1xf32>
      tpu.vector_store %arg10[%c0_19, %c0_20], %27 {strides = array<i32>} : memref<8x1xf32, #tpu.memory_space<vmem>>, vector<8x1xf32>,
    } else {
    }
    %c0 = arith.constant 0 : index
    %c0_1 = arith.constant 0 : index
    %3 = vector.load %arg2[%c0, %c0_1] : memref<1x128xi32, #tpu.memory_space<vmem>>, vector<1x128xi32>
    %4 = tpu.iota {dimensions = array<i32: 0>} : vector<8x128xi32>
    %c8_i32 = arith.constant 8 : i32
    %5 = arith.muli %arg0, %c8_i32 : i32
    %6 = vector.broadcast %5 : i32 to vector<8x128xi32>
    %7 = arith.addi %4, %6 : vector<8x128xi32>
    %8 = vector.broadcast %3 : vector<1x128xi32> to vector<8x128xi32>
    %9 = arith.cmpi eq, %7, %8 : vector<8x128xi32>
    %10 = arith.extui %9 : vector<8x128xi1> to vector<8x128xi32>
    %11 = arith.sitofp %10 : vector<8x128xi32> to vector<8x128xf32>
    %c0_2 = arith.constant 0 : index
    %c0_3 = arith.constant 0 : index
    %12 = vector.load %arg9[%c0_2, %c0_3] : memref<8x32xf32, #tpu.memory_space<vmem>>, vector<8x32xf32>
    %c0_4 = arith.constant 0 : index
    %c0_5 = arith.constant 0 : index
    %13 = vector.load %arg3[%c0_4, %c0_5] : memref<128x32xf32, #tpu.memory_space<vmem>>, vector<128x32xf32>
    %cst = arith.constant dense<0.000000e+00> : vector<8x32xf32>
    %14 = tpu.matmul %11, %13, %cst {dimension_numbers = #tpu.dot_dimension_numbers<[1], [0], [0], [1], [0, 0, 1, 1], [], []>} : vector<8x128xf32>, vector<128x32xf32>, vector<8x32xf32> -> vector<8x32xf32>
    %15 = arith.addf %12, %14 : vector<8x32xf32>
    %c0_6 = arith.constant 0 : index
    %c0_7 = arith.constant 0 : index
    %16 = vector.load %arg9[%c0_6, %c0_7] : memref<8x32xf32, #tpu.memory_space<vmem>>, vector<8x32xf32>
    tpu.vector_store %arg9[%c0_6, %c0_7], %15 {strides = array<i32>} : memref<8x32xf32, #tpu.memory_space<vmem>>, vector<8x32xf32>,
    %c0_8 = arith.constant 0 : index
    %c0_9 = arith.constant 0 : index
    %17 = vector.load %arg10[%c0_8, %c0_9] : memref<8x1xf32, #tpu.memory_space<vmem>>, vector<8x1xf32>
    %cst_10 = arith.constant dense<0.000000e+00> : vector<8xf32>
    %18 = vector.multi_reduction <add>, %11, %cst_10 [1] : vector<8x128xf32> to vector<8xf32>
    %19 = vector.shape_cast %18 : vector<8xf32> to vector<8x1xf32>
    %20 = arith.addf %17, %19 : vector<8x1xf32>
    %c0_11 = arith.constant 0 : index
    %c0_12 = arith.constant 0 : index
    %21 = vector.load %arg10[%c0_11, %c0_12] : memref<8x1xf32, #tpu.memory_space<vmem>>, vector<8x1xf32>
    tpu.vector_store %arg10[%c0_11, %c0_12], %20 {strides = array<i32>} : memref<8x1xf32, #tpu.memory_space<vmem>>, vector<8x1xf32>,
    %c0_i32_13 = arith.constant 0 : i32
    %22 = arith.cmpi eq, %arg1, %c0_i32_13 : i32
    %23 = arith.extui %22 : i1 to i32
    %c0_i32_14 = arith.constant 0 : i32
    %24 = arith.cmpi ne, %23, %c0_i32_14 : i32
    scf.if %24 {
      %c0_15 = arith.constant 0 : index
      %c0_16 = arith.constant 0 : index
      %25 = vector.load %arg10[%c0_15, %c0_16] : memref<8x1xf32, #tpu.memory_space<vmem>>, vector<8x1xf32>
      %cst_17 = arith.constant 1.000000e+00 : f32
      %26 = vector.broadcast %cst_17 : f32 to vector<8x1xf32>
      %27 = arith.maximumf %25, %26 : vector<8x1xf32>
      %c0_18 = arith.constant 0 : index
      %c0_19 = arith.constant 0 : index
      %28 = vector.load %arg9[%c0_18, %c0_19] : memref<8x32xf32, #tpu.memory_space<vmem>>, vector<8x32xf32>
      %29 = tpu.reciprocal %27 : vector<8x1xf32> -> vector<8x1xf32>
      %30 = vector.broadcast %29 : vector<8x1xf32> to vector<8x32xf32>
      %31 = arith.mulf %28, %30 : vector<8x32xf32>
      %c0_20 = arith.constant 0 : index
      %c0_21 = arith.constant 0 : index
      %32 = vector.load %arg4[%c0_20, %c0_21] : memref<32x32xf32, #tpu.memory_space<vmem>>, vector<32x32xf32>
      %cst_22 = arith.constant dense<0.000000e+00> : vector<8x32xf32>
      %33 = tpu.matmul %31, %32, %cst_22 {dimension_numbers = #tpu.dot_dimension_numbers<[1], [0], [0], [1], [0, 0, 1, 1], [], []>} : vector<8x32xf32>, vector<32x32xf32>, vector<8x32xf32> -> vector<8x32xf32>
      %c0_23 = arith.constant 0 : index
      %c0_24 = arith.constant 0 : index
      %34 = vector.load %arg5[%c0_23, %c0_24] : memref<1x32xf32, #tpu.memory_space<vmem>>, vector<1x32xf32>
      %35 = vector.broadcast %34 : vector<1x32xf32> to vector<8x32xf32>
      %36 = arith.addf %33, %35 : vector<8x32xf32>
      %cst_25 = arith.constant 0.000000e+00 : f32
      %37 = vector.broadcast %cst_25 : f32 to vector<8x32xf32>
      %38 = arith.maximumf %36, %37 : vector<8x32xf32>
      %c0_26 = arith.constant 0 : index
      %c0_27 = arith.constant 0 : index
      %39 = vector.load %arg6[%c0_26, %c0_27] : memref<32x1xf32, #tpu.memory_space<vmem>>, vector<32x1xf32>
      %cst_28 = arith.constant dense<0.000000e+00> : vector<8x1xf32>
      %40 = tpu.matmul %38, %39, %cst_28 {dimension_numbers = #tpu.dot_dimension_numbers<[1], [0], [0], [1], [0, 0, 1, 1], [], []>} : vector<8x32xf32>, vector<32x1xf32>, vector<8x1xf32> -> vector<8x1xf32>
      %c0_29 = arith.constant 0 : index
      %c0_30 = arith.constant 0 : index
      %41 = vector.load %arg7[%c0_29, %c0_30] : memref<1x1xf32, #tpu.memory_space<vmem>>, vector<1x1xf32>
      %42 = vector.broadcast %41 : vector<1x1xf32> to vector<8x1xf32>
      %43 = arith.addf %40, %42 : vector<8x1xf32>
      %cst_31 = arith.constant 0.000000e+00 : f32
      %cst_32 = arith.constant 2.000000e+01 : f32
      %44 = vector.broadcast %cst_31 : f32 to vector<8x1xf32>
      %45 = arith.maximumf %44, %43 : vector<8x1xf32>
      %46 = vector.broadcast %cst_32 : f32 to vector<8x1xf32>
      %47 = arith.minimumf %46, %45 : vector<8x1xf32>
      %c0_33 = arith.constant 0 : index
      %c0_34 = arith.constant 0 : index
      %48 = vector.load %arg8[%c0_33, %c0_34] : memref<8x1xf32, #tpu.memory_space<vmem>>, vector<8x1xf32>
      tpu.vector_store %arg8[%c0_33, %c0_34], %47 {strides = array<i32>} : memref<8x1xf32, #tpu.memory_space<vmem>>, vector<8x1xf32>,
    } else {
    }
    return
  }
  func.func @transform_0(%arg0: i32, %arg1: i32) -> (i32, i32) {
    %c0_i32 = arith.constant 0 : i32
    %c0_i32_0 = arith.constant 0 : i32
    return %c0_i32, %arg1 : i32, i32
  }
  func.func @transform_1(%arg0: i32, %arg1: i32) -> (i32, i32) {
    %c0_i32 = arith.constant 0 : i32
    %c0_i32_0 = arith.constant 0 : i32
    return %arg1, %c0_i32 : i32, i32
  }
  func.func @transform_2(%arg0: i32, %arg1: i32) -> (i32, i32) {
    %c0_i32 = arith.constant 0 : i32
    %c0_i32_0 = arith.constant 0 : i32
    %c0_i32_1 = arith.constant 0 : i32
    return %c0_i32, %c0_i32_0 : i32, i32
  }
  func.func @transform_3(%arg0: i32, %arg1: i32) -> (i32, i32) {
    %c0_i32 = arith.constant 0 : i32
    %c0_i32_0 = arith.constant 0 : i32
    %c0_i32_1 = arith.constant 0 : i32
    return %c0_i32, %c0_i32_0 : i32, i32
  }
  func.func @transform_4(%arg0: i32, %arg1: i32) -> (i32, i32) {
    %c0_i32 = arith.constant 0 : i32
    %c0_i32_0 = arith.constant 0 : i32
    %c0_i32_1 = arith.constant 0 : i32
    return %c0_i32, %c0_i32_0 : i32, i32
  }
  func.func @transform_5(%arg0: i32, %arg1: i32) -> (i32, i32) {
    %c0_i32 = arith.constant 0 : i32
    %c0_i32_0 = arith.constant 0 : i32
    %c0_i32_1 = arith.constant 0 : i32
    return %c0_i32, %c0_i32_0 : i32, i32
  }
  func.func @transform_6(%arg0: i32, %arg1: i32) -> (i32, i32) {
    %c0_i32 = arith.constant 0 : i32
    %c0_i32_0 = arith.constant 0 : i32
    return %arg0, %c0_i32 : i32, i32
  }
}

</mosaic_0001>

<bundles_post_ra>
// kernel: tpu_custom_call.1
= control target key start
LH: loop header
LB: loop body
LE: loop exit
PB: predicated region body
PF: predicated region fallthrough
CT: control target
= control target key end

     0   :  { %v34_v0 = vlaneseq  ;;  %v466_v2 = vmov 0.0|0.0   ;;  %vm467_vm0 = vmmov 0   ;;  %v468_v5 = vmov 0.0   ;;  %s620_s0 = inlined_call_operand.vmem [shape: s32[1,128], index: 0, kind: input, shape index: {}]   ;;  %s621_s1 = inlined_call_operand.vmem [shape: f32[128,32], index: 1, kind: input, shape index: {}]   ;;  %s622_s2 = inlined_call_operand.vmem [shape: f32[32,32], index: 2, kind: input, shape index: {}]   ;;  %s623_s4 = inlined_call_operand.vmem [shape: f32[32,1], index: 4, kind: input, shape index: {}]   ;;  %s624_s5 = inlined_call_operand.<no memory space> [shape: f32[1,1], index: 5, kind: input, shape index: {}]   ;;  %s625_s3 = inlined_call_operand.vmem [shape: f32[1,32], index: 3, kind: input, shape index: {}]   ;;  %s626_s6 = inlined_call_operand.vmem [shape: f32[8,1], index: 6, kind: output, shape index: {}]  }
   0x1   :  { %v331_v1 = vld [vmem:[%s620_s0] ss:$0 sm:$0xff]  ;;  %422 = vmatprep.subr.bf16.mxu0 %v466_v2  ;;  %v48_v4 = vld [vmem:[%s621_s1 + $0x8] sm:$0xff]  ;;  %397 = vmatprep.mubr.msk.f32.mxu0 %vm467_vm0, %v468_v5  ;;  %vm31_vm1 = vcmask 7168   ;;  %v49_v8 = vld [vmem:[%s621_s1 + $0x10] sm:$0xff]  ;;  %v469_v26 = vmov 0   ;;  %v11_v57 = vstv %s624_s5 }
   0x2   :  { %v47_v3 = vld [vmem:[%s621_s1] sm:$0xff]  ;;  %v35_v6 = vshrl.u32 %v34_v0, 7  ;;  %v50_v9 = vld [vmem:[%s621_s1 + $0x18] sm:$0xff]  ;;  %32 = vst.msk [vmem:[#allocation3] sm:$0xff] %vm31_vm1, %v468_v5  ;;  %446 = vmatprep.subr.bf16.mxu1 %v466_v2  ;;  %408 = vmatprep.mubr.msk.f32.mxu1 %vm467_vm0, %v468_v5  ;;  %v52_v13 = vld [vmem:[%s621_s1 + $0x28] sm:$0xff]  ;;  %v470_v31 = vmov 1.0  }
   0x3   :  { %v423_v7 = vpack.c.bf16 %v48_v4, %v47_v3  ;;  %v426_v10 = vpack.c.bf16 %v50_v9, %v49_v8  ;;  %v51_v12 = vld [vmem:[%s621_s1 + $0x20] sm:$0xff]  ;;  %v53_v15 = vld [vmem:[%s621_s1 + $0x30] sm:$0xff]  ;;  %v54_v16 = vld [vmem:[%s621_s1 + $0x38] sm:$0xff]  ;;  %463 = vset.pattern.permute.xlu0 %v469_v26  ;;  %vm29_vm3 = vcmask 261120   ;;  %12 = vst [vmem:[#allocation4] sm:$0x1] %v11_v57 }
   0x4   :  { %vm43_vm2 = vcmp.eq.s32.totalorder %v35_v6, %v331_v1  ;;  %v429_v14 = vpack.c.bf16 %v52_v13, %v51_v12  ;;  %v432_v17 = vpack.c.bf16 %v54_v16, %v53_v15  ;;  %v55_v18 = vld [vmem:[%s621_s1 + $0x40] sm:$0xff]  ;;  %v56_v19 = vld [vmem:[%s621_s1 + $0x48] sm:$0xff]  ;;  %v57_v21 = vld [vmem:[%s621_s1 + $0x50] sm:$0xff]  ;;  %30 = vst.msk [vmem:[#allocation2] sm:$0xff] %vm29_vm3, %v468_v5 }
   0x5   :  { %424 = vmatpush3.bf16.msra.mxu0 %v423_v7  ;;  %v332_v11 = vsel %vm43_vm2, 1.0, %v468_v5  ;;  %v435_v20 = vpack.c.bf16 %v56_v19, %v55_v18  ;;  %v58_v22 = vld [vmem:[%s621_s1 + $0x58] sm:$0xff]  ;;  %v59_v24 = vld [vmem:[%s621_s1 + $0x60] sm:$0xff]  ;;  %v60_v25 = vld [vmem:[%s621_s1 + $0x68] sm:$0xff] }
   0x6   :  { %425 = vmatprep.subr.bf16.mxu0 %v466_v2  ;;  %137 = vadd.xlane.f32.xlu0 %v332_v11  ;;  %v438_v23 = vpack.c.bf16 %v58_v22, %v57_v21  ;;  %v441_v27 = vpack.c.bf16 %v60_v25, %v59_v24  ;;  %v61_v28 = vld [vmem:[%s621_s1 + $0x70] sm:$0xff]  ;;  %v62_v29 = vld [vmem:[%s621_s1 + $0x78] sm:$0xff]  ;;  %v155_v32 = vld [vmem:[%s622_s2] sm:$0xff] }
   0x7   :  { %v444_v30 = vpack.c.bf16 %v62_v29, %v61_v28  ;;  %v156_v33 = vld [vmem:[%s622_s2 + $0x8] sm:$0xff]  ;;  %v157_v34 = vld [vmem:[%s622_s2 + $0x10] sm:$0xff]  ;;  %v158_v36 = vld [vmem:[%s622_s2 + $0x18] sm:$0xff] }
   0x8   :  { %v447_v35 = vpack.c.bf16 %v156_v33, %v155_v32  ;;  %v450_v37 = vpack.c.bf16 %v158_v36, %v157_v34  ;;  %v240_v48 = vld [vmem:[%s623_s4] sm:$0xff]  ;;  %v241_v49 = vld [vmem:[%s623_s4 + $0x8] sm:$0xff]  ;;  %v242_v54 = vld [vmem:[%s623_s4 + $0x10] sm:$0xff] }
   0x9   :  { %427 = vmatpush3.bf16.msra.mxu0 %v426_v10  ;;  %v136_v38 = vld [vmem:[#allocation3] sm:$0xff]  ;;  %v453_v52 = vpack.c.bf16 %v241_v49, %v240_v48  ;;  %v243_v55 = vld [vmem:[%s623_s4 + $0x18] sm:$0xff]  ;;  %v334_v58 = vld [vmem:[%s625_s3] ss:$0 sm:$0xff] }
   0xa   :  { %428 = vmatprep.subr.bf16.mxu0 %v466_v2  ;;  %448 = vmatpush3.bf16.msra.mxu1 %v447_v35  ;;  %v456_v56 = vpack.c.bf16 %v243_v55, %v242_v54  ;;  %v336_v63 = vld [vmem:[#allocation4] ss:$0 sm:$0xff] }
   0xb   :  { %449 = vmatprep.subr.bf16.mxu1 %v466_v2  ;;  %v46_v44 = vld [vmem:[#allocation2] sm:$0xff] }
   0xd   :  { %430 = vmatpush3.bf16.msra.mxu0 %v429_v14 }
   0xe   :  { %431 = vmatprep.subr.bf16.mxu0 %v466_v2  ;;  %451 = vmatpush3.bf16.msra.mxu1 %v450_v37 }
   0xf   :  { %452 = vmatprep.subr.bf16.mxu1 %v466_v2 }
  0x11   :  { %433 = vmatpush3.bf16.msra.mxu0 %v432_v17 }
  0x12   :  { %434 = vmatprep.subr.bf16.mxu0 %v466_v2 }
  0x15   :  { %436 = vmatpush3.bf16.msra.mxu0 %v435_v20 }
  0x16   :  { %437 = vmatprep.subr.bf16.mxu0 %v466_v2 }
  0x19   :  { %439 = vmatpush3.bf16.msra.mxu0 %v438_v23 }
  0x1a   :  { %440 = vmatprep.subr.bf16.mxu0 %v466_v2 }
  0x1d   :  { %442 = vmatpush3.bf16.msra.mxu0 %v441_v27 }
  0x1e   :  { %443 = vmatprep.subr.bf16.mxu0 %v466_v2 }
  0x21   :  { %445 = vmatpush3.bf16.msra.mxu0 %v444_v30 }
  0x24   :  { %398 = vmatmul.mubr.msk.f32.vlgmr.msra.gmra.mrb[0].mxu0 %vm43_vm2, %v470_v31 }
  0x93   :  { %v138_v39 = vpop.xlane.xlu0 %137 }
  0x94   :  { %v139_v40 = vadd.f32 %v138_v39, %v136_v38 }
  0x96   :  { %141 = vst.msk [vmem:[#allocation3] sm:$0xff] %vm31_vm1, %v139_v40 }
  0x9d   :  { %v145_v41 = vld [vmem:[#allocation3] sm:$0xff] }
  0x9e   :  { %v146_v42 = vmax.f32 %v145_v41, 1.0 }
  0xa0   :  { %464 = vrcp.f32 %v146_v42 }
  0xaa   :  { %v465_v43 = vpop.eup %464 }
  0xab   :  { %151 = vperm.xlu0 %463, %v465_v43  }
  0xf7   :  { %v129_v45 = vpop.f32.mrb[0].mxu0 }
  0xf8   :  { %v133_v46 = vadd.f32 %v129_v45, %v46_v44  ;;  %v399_v47 = vpop.f32.mrb[1].mxu0 }
  0xfa   :  { %135 = vst.msk [vmem:[#allocation2] sm:$0xff] %vm29_vm3, %v133_v46 }
 0x101   :  { %v147_v50 = vld [vmem:[#allocation2] sm:$0xff] }
 0x12a   :  { %v152_v51 = vpop.permute.xlu0 %151 }
 0x12b   :  { %v154_v53 = vmul.f32 %v152_v51, %v147_v50 }
 0x12d   :  { %409 = vmatmul.mubr.msk.f32.vlgmr.msra.gmra.mrb[0].mxu1 %vm29_vm3, %v154_v53 }
 0x12e   :  { %454 = vmatpush3.bf16.msra.mxu1 %v453_v52  ;;  %419 = vmatprep.mubr.msk.f32.mxu1 %vm467_vm0, %v468_v5 }
 0x12f   :  { %455 = vmatprep.subr.bf16.mxu1 %v466_v2 }
 0x132   :  { %457 = vmatpush3.bf16.msra.mxu1 %v456_v56 }
 0x200   :  { %v235_v59 = vpop.f32.mrb[0].mxu1 }
 0x201   :  { %v236_v60 = vadd.f32 %v334_v58, %v235_v59  ;;  %v410_v61 = vpop.f32.mrb[1].mxu1 }
 0x203   :  { %v239_v62 = vmax.f32 %v236_v60, 0.0 }
 0x205   :  { %420 = vmatmul.mubr.msk.f32.vlgmr.msra.gmra.mrb[2].mxu1 %vm29_vm3, %v239_v62 }
 0x2d8   :  { %v320_v0 = vpop.f32.mrb[2].mxu1 }
 0x2d9   :  { %v321_v1 = vadd.f32 %v336_v63, %v320_v0  ;;  %v421_v2 = vpop.f32.mrb[3].mxu1 }
 0x2db   :  { %v324_v3 = vmax.f32 %v321_v1, 0.0 }
 0x2dd   :  { %v325_v4 = vmin.f32 %v324_v3, 20.0 }
 0x2df   :  { %326 = vst.msk [vmem:[%s626_s6] sm:$0xff] %vm31_vm1, %v325_v4 }

</bundles_post_ra>
